<compile_context>
chip_gen: v7x
topology: tpu7x:2x2x1
jax: 0.10.0
libtpu: 0.0.40
codegen_flags: <defaults>
</compile_context>

<pallas_src>
import jax
import jax.numpy as jnp
from jax.experimental import pallas as pl
from jax.experimental.pallas import tpu as pltpu


def _round_up(n, m):
    return ((n + m - 1) // m) * m


def mlp_kernel(x_ref,
               w1_ref, b1_ref,
               w2_ref, b2_ref,
               w3_ref, b3_ref,
               w4_ref, b4_ref,
               o_ref):
    # Feature-major: activations are (features, batch_tile); batch on the lane axis.
    x = x_ref[...]                                                         # (nb_in, T)
    h = jnp.dot(w1_ref[...], x, preferred_element_type=jnp.float32) + b1_ref[...]
    h = jnp.maximum(h, 0.0)                                                # (32, T)
    h = jnp.dot(w2_ref[...], h, preferred_element_type=jnp.float32) + b2_ref[...]
    h = jnp.maximum(h, 0.0)                                                # (16, T)
    h = jnp.dot(w3_ref[...], h, preferred_element_type=jnp.float32) + b3_ref[...]
    h = jnp.maximum(h, 0.0)                                                # (8, T)
    h = jnp.dot(w4_ref[...], h, preferred_element_type=jnp.float32) + b4_ref[...]
    o_ref[...] = h.astype(o_ref.dtype)                                     # (nb_out, T)


def regressor_forward(x, params, *, batch_tile=None):
    """x: (B, nb_in) float32.

    params: PyTorch-layout weights w{i}: (out, in) and biases b{i}: (out, 1).
    Returns (B, nb_out) float32.
    """
    B, nb_in = x.shape
    nb_out = params["w4"].shape[0]

    # Lane-dense tile: multiple of 128 rows on the lane axis.  8192 default keeps the
    # per-step working set small on every generation while amortizing step overhead.
    if batch_tile is None:
        batch_tile = min(8192, _round_up(B, 128))
    assert batch_tile % 128 == 0, "batch_tile must be a multiple of 128 (lane width)"

    # Pad batch to a whole number of tiles; padded columns are dead lanes that never
    # contaminate real outputs (computation is independent per column).
    Bp = _round_up(B, batch_tile)
    x_t = x.T                                                              # (nb_in, B)
    if Bp != B:
        x_t = jnp.pad(x_t, ((0, 0), (0, Bp - B)))

    w1, b1 = params["w1"], params["b1"]
    w2, b2 = params["w2"], params["b2"]
    w3, b3 = params["w3"], params["b3"]
    w4, b4 = params["w4"], params["b4"]

    grid = (Bp // batch_tile,)
    resident = lambda i: (0, 0)       # tiny weights/biases stay resident every step

    flops = 2 * Bp * (nb_in * 32 + 32 * 16 + 16 * 8 + 8 * nb_out)
    weight_bytes = 4 * sum(int(params[k].size) for k in params)
    bytes_accessed = 4 * Bp * (nb_in + nb_out) + weight_bytes

    out_t = pl.pallas_call(
        mlp_kernel,
        out_shape=jax.ShapeDtypeStruct((nb_out, Bp), x.dtype),
        grid_spec=pltpu.PrefetchScalarGridSpec(
            num_scalar_prefetch=0,
            grid=grid,
            in_specs=[
                pl.BlockSpec((nb_in, batch_tile), lambda i: (0, i)),
                pl.BlockSpec(w1.shape, resident), pl.BlockSpec(b1.shape, resident),
                pl.BlockSpec(w2.shape, resident), pl.BlockSpec(b2.shape, resident),
                pl.BlockSpec(w3.shape, resident), pl.BlockSpec(b3.shape, resident),
                pl.BlockSpec(w4.shape, resident), pl.BlockSpec(b4.shape, resident),
            ],
            out_specs=pl.BlockSpec((nb_out, batch_tile), lambda i: (0, i)),
        ),
        compiler_params=pltpu.CompilerParams(
            dimension_semantics=("parallel",),          # batch tiles shard across TCs on v7x
            vmem_limit_bytes=32 * 1024 * 1024),
        cost_estimate=pl.CostEstimate(
            flops=flops, transcendentals=0, bytes_accessed=bytes_accessed),
    )(x_t, w1, b1, w2, b2, w3, b3, w4, b4)

    return out_t[:, :B].T                                                  # (B, nb_out)


def init_params(key, nb_in, nb_out):
    """Deterministic init mirroring nn.Linear: W (out, in), b (out, 1)."""
    dims = [(nb_in, 32), (32, 16), (16, 8), (8, nb_out)]
    params = {}
    for idx, (fan_in, fan_out) in enumerate(dims, start=1):
        key, kw, kb = jax.random.split(key, 3)
        bound = 1.0 / jnp.sqrt(fan_in)   # same bound as torch nn.Linear default init
        params[f"w{idx}"] = jax.random.uniform(
            kw, (fan_out, fan_in), jnp.float32, -bound, bound)
        params[f"b{idx}"] = jax.random.uniform(
            kb, (fan_out, 1), jnp.float32, -bound, bound)
    return params


def reference_forward(x, params):
    h = x
    for i in (1, 2, 3):
        h = jnp.maximum(h @ params[f"w{i}"].T + params[f"b{i}"].T, 0.0)
    return h @ params["w4"].T + params["b4"].T


if __name__ == "__main__":
    nb_in, nb_out = 16, 4
    batch = 8

    key = jax.random.PRNGKey(0)
    key, kx = jax.random.split(key)
    x = jax.random.normal(kx, (batch, nb_in), jnp.float32)
    params = init_params(key, nb_in, nb_out)

    out = regressor_forward(x, params)
    jax.block_until_ready(out)

    ref = reference_forward(x, params)
    assert out.shape == (batch, nb_out)
    assert jnp.allclose(out, ref, atol=1e-5, rtol=1e-5), "mismatch vs JAX reference"

    print("KERNEL_OK")
</pallas_src>

<mosaic_0001>
module attributes {stable_mosaic.version = 11 : i64} {
  func.func @mlp_kernel(%arg0: i32, %arg1: memref<16x128xf32, #tpu.memory_space<vmem>>, %arg2: memref<32x16xf32, #tpu.memory_space<vmem>>, %arg3: memref<32x1xf32, #tpu.memory_space<vmem>>, %arg4: memref<16x32xf32, #tpu.memory_space<vmem>>, %arg5: memref<16x1xf32, #tpu.memory_space<vmem>>, %arg6: memref<8x16xf32, #tpu.memory_space<vmem>>, %arg7: memref<8x1xf32, #tpu.memory_space<vmem>>, %arg8: memref<4x8xf32, #tpu.memory_space<vmem>>, %arg9: memref<4x1xf32, #tpu.memory_space<vmem>>, %arg10: memref<4x128xf32, #tpu.memory_space<vmem>>) attributes {dimension_semantics = [#tpu.dimension_semantics<parallel>], iteration_bounds = array<i64: 1>, scalar_prefetch = 0 : i64, scratch_operands = 0 : i64, tpu.core_type = #tpu.core_type<tc>, window_params = [{transform_indices = @transform_0, window_bounds = array<i64: 16, 128>}, {pipeline_mode = #tpu.pipeline_mode<synchronous>, transform_indices = @transform_1, window_bounds = array<i64: 32, 16>}, {pipeline_mode = #tpu.pipeline_mode<synchronous>, transform_indices = @transform_2, window_bounds = array<i64: 32, 1>}, {pipeline_mode = #tpu.pipeline_mode<synchronous>, transform_indices = @transform_3, window_bounds = array<i64: 16, 32>}, {pipeline_mode = #tpu.pipeline_mode<synchronous>, transform_indices = @transform_4, window_bounds = array<i64: 16, 1>}, {pipeline_mode = #tpu.pipeline_mode<synchronous>, transform_indices = @transform_5, window_bounds = array<i64: 8, 16>}, {pipeline_mode = #tpu.pipeline_mode<synchronous>, transform_indices = @transform_6, window_bounds = array<i64: 8, 1>}, {pipeline_mode = #tpu.pipeline_mode<synchronous>, transform_indices = @transform_7, window_bounds = array<i64: 4, 8>}, {pipeline_mode = #tpu.pipeline_mode<synchronous>, transform_indices = @transform_8, window_bounds = array<i64: 4, 1>}, {transform_indices = @transform_9, window_bounds = array<i64: 4, 128>}]} {
    %c0 = arith.constant 0 : index
    %c0_0 = arith.constant 0 : index
    %0 = vector.load %arg1[%c0, %c0_0] : memref<16x128xf32, #tpu.memory_space<vmem>>, vector<16x128xf32>
    %c0_1 = arith.constant 0 : index
    %c0_2 = arith.constant 0 : index
    %1 = vector.load %arg2[%c0_1, %c0_2] : memref<32x16xf32, #tpu.memory_space<vmem>>, vector<32x16xf32>
    %cst = arith.constant dense<0.000000e+00> : vector<32x128xf32>
    %2 = tpu.matmul %1, %0, %cst {dimension_numbers = #tpu.dot_dimension_numbers<[1], [0], [0], [1], [0, 0, 1, 1], [], []>} : vector<32x16xf32>, vector<16x128xf32>, vector<32x128xf32> -> vector<32x128xf32>
    %c0_3 = arith.constant 0 : index
    %c0_4 = arith.constant 0 : index
    %3 = vector.load %arg3[%c0_3, %c0_4] : memref<32x1xf32, #tpu.memory_space<vmem>>, vector<32x1xf32>
    %4 = vector.broadcast %3 : vector<32x1xf32> to vector<32x128xf32>
    %5 = arith.addf %2, %4 : vector<32x128xf32>
    %cst_5 = arith.constant 0.000000e+00 : f32
    %6 = vector.broadcast %cst_5 : f32 to vector<32x128xf32>
    %7 = arith.maximumf %5, %6 : vector<32x128xf32>
    %c0_6 = arith.constant 0 : index
    %c0_7 = arith.constant 0 : index
    %8 = vector.load %arg4[%c0_6, %c0_7] : memref<16x32xf32, #tpu.memory_space<vmem>>, vector<16x32xf32>
    %cst_8 = arith.constant dense<0.000000e+00> : vector<16x128xf32>
    %9 = tpu.matmul %8, %7, %cst_8 {dimension_numbers = #tpu.dot_dimension_numbers<[1], [0], [0], [1], [0, 0, 1, 1], [], []>} : vector<16x32xf32>, vector<32x128xf32>, vector<16x128xf32> -> vector<16x128xf32>
    %c0_9 = arith.constant 0 : index
    %c0_10 = arith.constant 0 : index
    %10 = vector.load %arg5[%c0_9, %c0_10] : memref<16x1xf32, #tpu.memory_space<vmem>>, vector<16x1xf32>
    %11 = vector.broadcast %10 : vector<16x1xf32> to vector<16x128xf32>
    %12 = arith.addf %9, %11 : vector<16x128xf32>
    %cst_11 = arith.constant 0.000000e+00 : f32
    %13 = vector.broadcast %cst_11 : f32 to vector<16x128xf32>
    %14 = arith.maximumf %12, %13 : vector<16x128xf32>
    %c0_12 = arith.constant 0 : index
    %c0_13 = arith.constant 0 : index
    %15 = vector.load %arg6[%c0_12, %c0_13] : memref<8x16xf32, #tpu.memory_space<vmem>>, vector<8x16xf32>
    %cst_14 = arith.constant dense<0.000000e+00> : vector<8x128xf32>
    %16 = tpu.matmul %15, %14, %cst_14 {dimension_numbers = #tpu.dot_dimension_numbers<[1], [0], [0], [1], [0, 0, 1, 1], [], []>} : vector<8x16xf32>, vector<16x128xf32>, vector<8x128xf32> -> vector<8x128xf32>
    %c0_15 = arith.constant 0 : index
    %c0_16 = arith.constant 0 : index
    %17 = vector.load %arg7[%c0_15, %c0_16] : memref<8x1xf32, #tpu.memory_space<vmem>>, vector<8x1xf32>
    %18 = vector.broadcast %17 : vector<8x1xf32> to vector<8x128xf32>
    %19 = arith.addf %16, %18 : vector<8x128xf32>
    %cst_17 = arith.constant 0.000000e+00 : f32
    %20 = vector.broadcast %cst_17 : f32 to vector<8x128xf32>
    %21 = arith.maximumf %19, %20 : vector<8x128xf32>
    %c0_18 = arith.constant 0 : index
    %c0_19 = arith.constant 0 : index
    %22 = vector.load %arg8[%c0_18, %c0_19] : memref<4x8xf32, #tpu.memory_space<vmem>>, vector<4x8xf32>
    %cst_20 = arith.constant dense<0.000000e+00> : vector<4x128xf32>
    %23 = tpu.matmul %22, %21, %cst_20 {dimension_numbers = #tpu.dot_dimension_numbers<[1], [0], [0], [1], [0, 0, 1, 1], [], []>} : vector<4x8xf32>, vector<8x128xf32>, vector<4x128xf32> -> vector<4x128xf32>
    %c0_21 = arith.constant 0 : index
    %c0_22 = arith.constant 0 : index
    %24 = vector.load %arg9[%c0_21, %c0_22] : memref<4x1xf32, #tpu.memory_space<vmem>>, vector<4x1xf32>
    %25 = vector.broadcast %24 : vector<4x1xf32> to vector<4x128xf32>
    %26 = arith.addf %23, %25 : vector<4x128xf32>
    %c0_23 = arith.constant 0 : index
    %c0_24 = arith.constant 0 : index
    %27 = vector.load %arg10[%c0_23, %c0_24] : memref<4x128xf32, #tpu.memory_space<vmem>>, vector<4x128xf32>
    tpu.vector_store %arg10[%c0_23, %c0_24], %26 {strides = array<i32>} : memref<4x128xf32, #tpu.memory_space<vmem>>, vector<4x128xf32>,
    return
  }
  func.func @transform_0(%arg0: i32) -> (i32, i32) {
    %c0_i32 = arith.constant 0 : i32
    %c0_i32_0 = arith.constant 0 : i32
    return %c0_i32, %arg0 : i32, i32
  }
  func.func @transform_1(%arg0: i32) -> (i32, i32) {
    %c0_i32 = arith.constant 0 : i32
    %c0_i32_0 = arith.constant 0 : i32
    %c0_i32_1 = arith.constant 0 : i32
    return %c0_i32, %c0_i32_0 : i32, i32
  }
  func.func @transform_2(%arg0: i32) -> (i32, i32) {
    %c0_i32 = arith.constant 0 : i32
    %c0_i32_0 = arith.constant 0 : i32
    %c0_i32_1 = arith.constant 0 : i32
    return %c0_i32, %c0_i32_0 : i32, i32
  }
  func.func @transform_3(%arg0: i32) -> (i32, i32) {
    %c0_i32 = arith.constant 0 : i32
    %c0_i32_0 = arith.constant 0 : i32
    %c0_i32_1 = arith.constant 0 : i32
    return %c0_i32, %c0_i32_0 : i32, i32
  }
  func.func @transform_4(%arg0: i32) -> (i32, i32) {
    %c0_i32 = arith.constant 0 : i32
    %c0_i32_0 = arith.constant 0 : i32
    %c0_i32_1 = arith.constant 0 : i32
    return %c0_i32, %c0_i32_0 : i32, i32
  }
  func.func @transform_5(%arg0: i32) -> (i32, i32) {
    %c0_i32 = arith.constant 0 : i32
    %c0_i32_0 = arith.constant 0 : i32
    %c0_i32_1 = arith.constant 0 : i32
    return %c0_i32, %c0_i32_0 : i32, i32
  }
  func.func @transform_6(%arg0: i32) -> (i32, i32) {
    %c0_i32 = arith.constant 0 : i32
    %c0_i32_0 = arith.constant 0 : i32
    %c0_i32_1 = arith.constant 0 : i32
    return %c0_i32, %c0_i32_0 : i32, i32
  }
  func.func @transform_7(%arg0: i32) -> (i32, i32) {
    %c0_i32 = arith.constant 0 : i32
    %c0_i32_0 = arith.constant 0 : i32
    %c0_i32_1 = arith.constant 0 : i32
    return %c0_i32, %c0_i32_0 : i32, i32
  }
  func.func @transform_8(%arg0: i32) -> (i32, i32) {
    %c0_i32 = arith.constant 0 : i32
    %c0_i32_0 = arith.constant 0 : i32
    %c0_i32_1 = arith.constant 0 : i32
    return %c0_i32, %c0_i32_0 : i32, i32
  }
  func.func @transform_9(%arg0: i32) -> (i32, i32) {
    %c0_i32 = arith.constant 0 : i32
    %c0_i32_0 = arith.constant 0 : i32
    return %c0_i32, %arg0 : i32, i32
  }
}

</mosaic_0001>

<bundles_post_ra>
// kernel: tpu_custom_call.1
= control target key start
LH: loop header
LB: loop body
LE: loop exit
PB: predicated region body
PF: predicated region fallthrough
CT: control target
= control target key end

     0   :  { %vm63_vm0 = vcmask 130048   ;;  %v544_v4 = vmov 0   ;;  %s672_s0 = inlined_call_operand.vmem [shape: f32[16,128], index: 0, kind: input, shape index: {}]   ;;  %s673_s1 = inlined_call_operand.vmem [shape: f32[32,16], index: 1, kind: input, shape index: {}]   ;;  %s674_s2 = inlined_call_operand.vmem [shape: f32[32,1], index: 2, kind: input, shape index: {}]   ;;  %s675_s3 = inlined_call_operand.vmem [shape: f32[16,32], index: 3, kind: input, shape index: {}]   ;;  %s676_s4 = inlined_call_operand.vmem [shape: f32[16,1], index: 4, kind: input, shape index: {}]   ;;  %s677_s5 = inlined_call_operand.vmem [shape: f32[8,16], index: 5, kind: input, shape index: {}]   ;;  %s678_s6 = inlined_call_operand.vmem [shape: f32[8,1], index: 6, kind: input, shape index: {}]   ;;  %s679_s7 = inlined_call_operand.vmem [shape: f32[4,8], index: 7, kind: input, shape index: {}]   ;;  %s680_s8 = inlined_call_operand.vmem [shape: f32[4,1], index: 8, kind: input, shape index: {}]   ;;  %s681_s9 = inlined_call_operand.hbm [shape: f32[4,128], index: 9, kind: output, shape index: {}]  }
   0x1   :  { %v33_v0 = vld [vmem:[%s672_s0] sm:$0xff]  ;;  %v34_v1 = vld [vmem:[%s672_s0 + $0x8] sm:$0xff]  ;;  %518 = vset.pattern.permute.xlu0 %v544_v4  ;;  %519 = vset.pattern.permute.xlu1 %v544_v4  ;;  %v41_v6 = vld [vmem:[%s674_s2 + $0x10] sm:$0xff] }
   0x2   :  { %v35_v2 = vld [vmem:[%s673_s1] sm:$0xff]  ;;  %v498_v3 = vpack.c.bf16 %v34_v1, %v33_v0  ;;  %v36_v7 = vld [vmem:[%s673_s1 + $0x8] sm:$0xff]  ;;  %55 = vperm.xlu1 %519, %v41_v6  }
   0x3   :  { %469 = vmatprep.mubr.msk.f32.mxu0 %vm63_vm0, %v35_v2  ;;  %v39_v5 = vld [vmem:[%s674_s2] sm:$0xff]  ;;  %v40_v8 = vld [vmem:[%s674_s2 + $0x8] sm:$0xff] }
   0x4   :  { %499 = vmatprep.subr.bf16.mxu0 %v498_v3  ;;  %45 = vperm.xlu0 %518, %v39_v5  }
   0x5   :  { %501 = vmatpush3.bf16.msra.mxu0 %v498_v3 }
   0x6   :  { %14 = vsyncpa [#allocation3], 0  ;;  %v37_v9 = vld [vmem:[%s673_s1 + $0x10] sm:$0xff]  ;;  %v42_v10 = vld [vmem:[%s674_s2 + $0x18] sm:$0xff]  ;;  %vm179_vm1 = vcmask 261120   ;;  %v545_v36 = vmov 0.0|0.0  }
   0x7   :  { %v38_v11 = vld [vmem:[%s673_s1 + $0x18] sm:$0xff]  ;;  %60 = vperm.xlu1 %519, %v42_v10   ;;  %v167_v12 = vld [vmem:[%s676_s4] sm:$0xff]  ;;  %v168_v13 = vld [vmem:[%s676_s4 + $0x8] sm:$0xff]  ;;  %510 = vmatprep.subr.bf16.mxu0 %v545_v36  ;;  %vm546_vm2 = vmmov 0   ;;  %v547_v37 = vmov 0.0   ;;  %vm351_vm3 = vcmask 64512  }
   0x8   :  { %470 = vmatmul.mubr.msk.f32.vlgmr.msra.gmra.mrb[0].mxu0 %vm63_vm0, %v36_v7  ;;  %50 = vperm.xlu0 %518, %v40_v8   ;;  %v264_v14 = vld [vmem:[%s678_s6] sm:$0xff]  ;;  %v166_v35 = vld [vmem:[%s675_s3 + $0x8] sm:$0xff]  ;;  %s548_s17 = smov [#allocation2]  }
   0x9   :  { %472 = vmatprep.mubr.msk.f32.mxu0 %vm63_vm0, %v37_v9  ;;  %v345_v15 = vld [vmem:[%s680_s8] sm:$0xf]  ;;  %s432_s18 = sshll.u32 %s548_s17, 4  ;;  %s433_s18 = int_to_ptr.vmem [resolvable:$true] %s432_s18 }
   0xa   :  { %v165_v16 = vld [vmem:[%s675_s3] sm:$0xff]  ;;  %p525_p1 = scmp.lt.s32.totalorder %s433_s18, %s433_s18 }
   0xb   :  { %176 = vperm.xlu1 %519, %v168_v13   ;;  %483 = vmatprep.mubr.msk.f32.mxu1 %vm179_vm1, %v165_v16  ;;  %v263_v47 = vld [vmem:[%s677_s5] sm:$0xff]  ;;  %s520_s5 = scalar_lea.vmem %s433_s18, 64 }
   0xc   :  { %473 = vmatmul.mubr.msk.f32.gmra.mrb[2].mxu0 %vm63_vm0, %v38_v11  ;;  %171 = vperm.xlu0 %518, %v167_v12   ;;  %v344_v53 = vld [vmem:[%s679_s7] sm:$0xf]  ;;  %p521_p0 = scmp.ne.s32.totalorder %s433_s18, %s520_s5  ;;  %p526_p2 = scmp.lt.s32.totalorder %s520_s5, %s520_s5 }
   0xd   :  { %490 = vmatprep.mubr.msk.f32.mxu0 %vm546_vm2, %v547_v37 }
   0xe   :  { %p527_p3 = por %p526_p2, %p525_p1 }
   0xf   :  { %348 = vperm.xlu1 %519, %v345_v15  }
  0x10   :  { %267 = vperm.xlu0 %518, %v264_v14   ;;  %p528_p4 = pnand %p527_p3, %p521_p0 }
  0x81   :  { %v56_v18 = vpop.permute.xlu1 %55 }
  0x83   :  { %v46_v17 = vpop.permute.xlu0 %45 }
  0x86   :  { %v61_v25 = vpop.permute.xlu1 %60 }
  0x87   :  { %v51_v19 = vpop.permute.xlu0 %50 }
  0x8a   :  { %v177_v38 = vpop.permute.xlu1 %176 }
  0x8b   :  { %v172_v40 = vpop.permute.xlu0 %171 }
  0x8e   :  { %v349_v54 = vpop.permute.xlu1 %348 }
  0x8f   :  { %v268_v48 = vpop.permute.xlu0 %267 }
  0xdb   :  { %v471_v20 = vpop.f32.mrb[0].mxu0 }
  0xdc   :  { %v148_v21 = vadd.f32 %v471_v20, %v51_v19  ;;  %v142_v22 = vpop.f32.mrb[1].mxu0 }
  0xdd   :  { %v143_v23 = vadd.f32 %v142_v22, %v46_v17 }
  0xde   :  { %v162_v24 = vmax.f32 %v148_v21, 0.0 }
  0xdf   :  { %v161_v26 = vmax.f32 %v143_v23, 0.0  ;;  %v474_v27 = vpop.f32.mrb[2].mxu0 }
  0xe0   :  { %v158_v28 = vadd.f32 %v474_v27, %v61_v25  ;;  %v152_v29 = vpop.f32.mrb[3].mxu0 }
  0xe1   :  { %v153_v30 = vadd.f32 %v152_v29, %v56_v18  ;;  %v502_v31 = vpack.c.bf16 %v162_v24, %v161_v26 }
  0xe2   :  { %v164_v32 = vmax.f32 %v158_v28, 0.0 }
  0xe3   :  { %v163_v33 = vmax.f32 %v153_v30, 0.0  ;;  %503 = vmatprep.subr.bf16.mxu1 %v502_v31 }
  0xe4   :  { %505 = vmatpush3.bf16.msra.mxu1 %v502_v31 }
  0xe5   :  { %v506_v34 = vpack.c.bf16 %v164_v32, %v163_v33 }
  0xe7   :  { %507 = vmatprep.subr.bf16.mxu1 %v506_v34 }
  0xe8   :  { %509 = vmatpush3.bf16.msra.mxu1 %v506_v34 }
  0xe9   :  { %493 = vmatprep.subr.mxu1 %v547_v37 }
  0xeb   :  { %484 = vmatmul.mubr.msk.f32.vlgmr.msra.gmra.mrb[0].mxu1 %vm179_vm1, %v166_v35 }
  0xec   :  { %495 = vmatprep.mubr.msk.f32.mxu1 %vm546_vm2, %v547_v37 }
 0x1be   :  { %v485_v39 = vpop.f32.mrb[0].mxu1 }
 0x1bf   :  { %v258_v41 = vadd.f32 %v485_v39, %v177_v38  ;;  %v252_v42 = vpop.f32.mrb[1].mxu1 }
 0x1c0   :  { %v253_v43 = vadd.f32 %v252_v42, %v172_v40 }
 0x1c1   :  { %v262_v44 = vmax.f32 %v258_v41, 0.0 }
 0x1c2   :  { %v261_v45 = vmax.f32 %v253_v43, 0.0 }
 0x1c4   :  { %v511_v46 = vpack.c.bf16 %v262_v44, %v261_v45 }
 0x1c6   :  { %512 = vmatpush3.bf16.msra.mxu0 %v511_v46 }
 0x1c9   :  { %491 = vmatmul.mubr.msk.f32.vlgmr.msra.gmra.mrb[4].mxu0 %vm63_vm0, %v263_v47 }
 0x29c   :  { %v339_v49 = vpop.f32.mrb[4].mxu0 }
 0x29d   :  { %v340_v50 = vadd.f32 %v339_v49, %v268_v48  ;;  %v492_v51 = vpop.f32.mrb[5].mxu0 }
 0x29f   :  { %v343_v52 = vmax.f32 %v340_v50, 0.0 }
 0x2a1   :  { %494 = vmatpush3.msra.mxu1 %v343_v52 }
 0x2a2   :  { %496 = vmatmul.mubr.msk.f32.vlgmr.msra.gmra.mrb[2].mxu1 %vm351_vm3, %v344_v53 }
 0x375   :  { %v421_v55 = vpop.f32.mrb[2].mxu1 }
 0x376   :  { %v422_v56 = vadd.f32 %v421_v55, %v349_v54  ;;  %v497_v57 = vpop.f32.mrb[3].mxu1 }
 0x378   :  { %425 = vst [vmem:[#allocation2] sm:$0xf] %v422_v56 }
 0x379   :  { %531 = shalt.err (!%p528_p4)
}
 0x37a   :  { %s532_s19 = scalar_lea.hbm %s681_s9, 64 }
 0x37b   :  { %p533_p5 = scmp.ne.s32.totalorder %s681_s9, %s532_s19  ;;  %p536_p6 = scmp.lt.u32.totalorder %s532_s19, %s681_s9 }
 0x37d   :  { %p538_p7 = pnand %p536_p6, %p533_p5 }
 0x37f   :  { %541 = shalt.err (!%p538_p7)
}
 0x380   :  { %435 = dma.vmem_to_hbm [thread:$0]  %s433_s18, 64, %s681_s9, [#allocation3]  }
 0x381   :  { %542 = dma.done.wait [#allocation3], 64  }
 0x382   :  { %543 = vsyncadd [#allocation3], 4294967232 }
 0x383   :  { %439 = vsyncpa [#allocation3], 1 }

</bundles_post_ra>
